<compile_context>
chip_gen: v6e
topology: v6e:2x2x1
jax: 0.10.0
libtpu: 0.0.40
codegen_flags: <defaults>
</compile_context>

<pallas_src>
import functools

import jax
import jax.numpy as jnp
from jax.experimental import pallas as pl
from jax.experimental.pallas import tpu as pltpu


# canonical ProtoPNet coefficients
BATCH_LOSS_COEFS = {"cross_entropy": 1.0, "cluster": 0.8, "separation": 0.08}
MODEL_LOSS_COEFS = {"l1": 1e-4}


def _round_up(x, m):
    return (x + m - 1) // m * m


def _vmem_limit_bytes():
    """Generation-aware VMEM budget (v5e/v6e: 128 MiB phys -> 96 MiB limit,
    v7x: 64 MiB phys -> 48 MiB limit)."""
    try:
        cap = pltpu.get_tpu_info().vmem_capacity_bytes
    except Exception:
        cap = 64 * 1024 * 1024          # conservative (v7x-sized) fallback
    return int(min(cap * 3 // 4, 96 * 1024 * 1024))


def _pick_p_tile(P, B, C, HW, sim_itemsize, vmem_limit):
    """Largest multiple-of-8 prototype tile whose double-buffered working set
    (counting VMEM lane padding) fits the per-chip budget."""
    if P <= 8:
        return int(P)
    lane_c = _round_up(C, 128)
    lane_hw = _round_up(HW, 128)
    per_row = (2 * B * lane_hw * sim_itemsize   # sim tile (double-buffered)
               + 2 * B * 128 * 4                # (B,TP,1) mask tile, lane-padded
               + 2 * 2 * lane_c * 4)            # w^T + class-id chunks
    resident = 2 * 2 * B * lane_c * 4 + 2 * B * 128 * 4   # logits/one-hot/out bufs
    budget = vmem_limit - resident - (2 << 20)            # headroom for Mosaic
    tp = max((budget // per_row) // 8 * 8, 8)
    return int(min(tp, _round_up(P, 8)))


# ----------------------------------------------------------------------------
# Kernel: one prototype-tile per grid step (fully parallel, no carries)
# ----------------------------------------------------------------------------
def _proto_loss_kernel(P, TP, logits_ref, t_oh_ref, same_ref, sim_ref,
                       w_ref, pid_ref, out_ref):
    """grid = (ceil(P/TP),), "parallel".

    logits_ref : (B, C)       resident
    t_oh_ref   : (B, C)       resident (one-hot targets)
    same_ref   : (B, TP, 1)   same-class mask chunk (1 if proto p is in class(b))
    sim_ref    : (B, TP, HW)  similarity-map chunk, HW on lanes (bf16 ok)
    w_ref      : (TP, C)      last-layer weights^T chunk
    pid_ref    : (TP, C)      prototype->class identity chunk
    out_ref    : (1, B, 128)  lanes 0..3 = same_max, other_max, l1_partial, ce
    """
    p = pl.program_id(0)
    batch = logits_ref.shape[0]
    ragged = (P % TP) != 0          # static Python bool

    # --- spatial max over HW (XLU lane reduce), reduce BEFORE the f32 cast ---
    tile_max = jnp.max(sim_ref[...], axis=-1, keepdims=True).astype(jnp.float32)
    same = same_ref[...].astype(jnp.float32)                       # (B, TP, 1)

    same_sel = jnp.where(same > 0.5, tile_max, -1e9)
    other_sel = jnp.where(same > 0.5, -1e9, tile_max)
    if ragged:
        rows3 = jax.lax.broadcasted_iota(jnp.int32, same.shape, 1)
        valid3 = rows3 < (P - p * TP)
        same_sel = jnp.where(valid3, same_sel, -1e9)
        other_sel = jnp.where(valid3, other_sel, -1e9)
    same_max = jnp.max(same_sel, axis=1)                           # (B, 1)
    other_max = jnp.max(other_sel, axis=1)                         # (B, 1)

    # --- L1 over this chunk of wrong-class last-layer connections ---
    l1_terms = jnp.abs(w_ref[...]) * (1.0 - pid_ref[...])          # (TP, C)
    if ragged:
        rows2 = jax.lax.broadcasted_iota(jnp.int32, l1_terms.shape, 0)
        l1_terms = jnp.where(rows2 < (P - p * TP), l1_terms, 0.0)
    l1p = jnp.sum(l1_terms, keepdims=True)                         # (1, 1)

    # --- per-sample cross entropy (redundant per block; the (B,C) logsumexp
    #     is negligible next to the sim-map DMA stream and stays fused) ---
    logits = logits_ref[...]
    t_oh = t_oh_ref[...]
    m = jnp.max(logits, axis=-1, keepdims=True)
    z = logits - m
    lse = jnp.log(jnp.sum(jnp.exp(z), axis=-1, keepdims=True))
    ce_per = jnp.sum(t_oh * (lse - z), axis=-1, keepdims=True)     # (B, 1)

    # --- single lane-dense write of this block's partials ---
    lane = jax.lax.broadcasted_iota(jnp.int32, (batch, 128), 1)
    row = (jnp.where(lane == 0, same_max, 0.0)
           + jnp.where(lane == 1, other_max, 0.0)
           + jnp.where(lane == 2, l1p, 0.0)
           + jnp.where(lane == 3, ce_per, 0.0))
    out_ref[0] = row


def protopnet_losses_pallas(logits, sim_maps, target_onehot, same_class,
                            last_layer_w, proto_class_id, p_tile=None):
    """sim_maps: [B, P, HW] native ProtoPNet layout (f32 or bf16).
    Returns (ce, cluster, separation, l1) as f32 scalars."""
    B, C = logits.shape
    _, P, HW = sim_maps.shape
    assert last_layer_w.shape == (C, P)
    assert proto_class_id.shape == (P, C)

    vmem_limit = _vmem_limit_bytes()
    if p_tile is None:
        tp = _pick_p_tile(P, B, C, HW, sim_maps.dtype.itemsize, vmem_limit)
    else:
        tp = int(p_tile)
        assert tp % 8 == 0 or tp == P, (P, tp)
    n_blocks = pl.cdiv(P, tp)

    # Small side inputs, laid out so the prototype axis is on sublanes
    # (no 128-alignment requirement, no transpose of the big tensor).
    same3 = same_class.astype(jnp.float32)[:, :, None]     # (B, P, 1)
    w_t = last_layer_w.astype(jnp.float32).T               # (P, C)   tiny
    pid = proto_class_id.astype(jnp.float32)               # (P, C)

    sim_bytes = B * P * HW * sim_maps.dtype.itemsize
    cost = pl.CostEstimate(
        flops=2 * B * P * HW + 2 * P * C,
        transcendentals=n_blocks * B * C,
        bytes_accessed=sim_bytes + 4 * (B * P + 2 * P * C + 2 * B * C
                                        + n_blocks * B * 128))

    out = pl.pallas_call(
        functools.partial(_proto_loss_kernel, int(P), tp),
        out_shape=jax.ShapeDtypeStruct((n_blocks, B, 128), jnp.float32),
        grid=(n_blocks,),
        in_specs=[
            pl.BlockSpec((B, C), lambda p: (0, 0)),          # logits (resident)
            pl.BlockSpec((B, C), lambda p: (0, 0)),          # one-hot targets
            pl.BlockSpec((B, tp, 1), lambda p: (0, p, 0)),   # same-class chunk
            pl.BlockSpec((B, tp, HW), lambda p: (0, p, 0)),  # sim-map chunk
            pl.BlockSpec((tp, C), lambda p: (p, 0)),         # last-layer W^T chunk
            pl.BlockSpec((tp, C), lambda p: (p, 0)),         # proto class-id chunk
        ],
        out_specs=pl.BlockSpec((1, B, 128), lambda p: (p, 0, 0)),
        compiler_params=pltpu.CompilerParams(
            dimension_semantics=("parallel",),   # independent blocks -> both TCs on v7x
            vmem_limit_bytes=vmem_limit),
        cost_estimate=cost,
    )(logits.astype(jnp.float32), target_onehot.astype(jnp.float32),
      same3, sim_maps, w_t, pid)

    # Tiny combine over the (n_blocks, B) partials (review-endorsed epilogue).
    same_max = jnp.max(out[:, :, 0], axis=0)     # (B,)
    other_max = jnp.max(out[:, :, 1], axis=0)    # (B,)
    l1 = jnp.sum(out[:, 0, 2])
    ce = jnp.mean(out[0, :, 3])
    cluster = -jnp.mean(same_max)
    separation = jnp.mean(other_max)
    return ce, cluster, separation, l1


# ----------------------------------------------------------------------------
# ProtoPNetLoss forward (glue: linear combination + loss-term dict)
# ----------------------------------------------------------------------------
@functools.partial(jax.jit, static_argnames=("num_classes", "p_tile"))
def protopnet_loss_forward(target, logits, sim_maps, proto_class_id,
                           last_layer_w, num_classes, p_tile=None):
    """sim_maps: [B, P, HW] prototype similarity maps (native ProtoPNet layout)."""
    target_onehot = jax.nn.one_hot(target, num_classes, dtype=jnp.float32)
    # one-hot @ proto_class_id^T is a row gather: same_class[b,p] = 1 iff
    # prototype p belongs to class target[b].
    same_class = jnp.take(proto_class_id.astype(jnp.float32), target, axis=1).T

    ce, cluster, separation, l1 = protopnet_losses_pallas(
        logits, sim_maps, target_onehot, same_class,
        last_layer_w, proto_class_id, p_tile=p_tile)

    unweighted = {"cross_entropy": ce, "cluster": cluster,
                  "separation": separation, "l1": l1}
    coefs = dict(BATCH_LOSS_COEFS)
    coefs.update(MODEL_LOSS_COEFS)

    # TODO(synk): the torch module calls .item() to populate the dict with
    # python floats; under jit we keep JAX scalars (no device syncs).
    loss_term_dict = {}
    total_loss = jnp.float32(0.0)
    for name, val in unweighted.items():
        coef = jnp.float32(coefs[name])
        weighted = val * coef
        loss_term_dict[name] = val
        loss_term_dict[name + "_weighted"] = weighted
        loss_term_dict[name + "_coef"] = coef
        total_loss = total_loss + weighted
    return total_loss, loss_term_dict


if __name__ == "__main__":
    key = jax.random.PRNGKey(0)
    B, C, P, HW = 8, 4, 20, 49   # batch, classes, prototypes, 7x7 spatial

    k1, k2, k3, k4 = jax.random.split(key, 4)
    logits = jax.random.normal(k1, (B, C), dtype=jnp.float32)
    # bf16 similarity maps in native [B, P, HW] layout (streamed as-is).
    sim_maps = jax.random.uniform(k2, (B, P, HW), dtype=jnp.float32).astype(jnp.bfloat16)
    target = jax.random.randint(k3, (B,), 0, C)

    # prototype class identity: 5 prototypes per class (deterministic)
    proto_class_id = jnp.zeros((P, C), dtype=jnp.float32)
    proto_class_id = proto_class_id.at[jnp.arange(P), jnp.arange(P) % C].set(1.0)

    # ProtoPNet-style last-layer init: +1 correct connections, -0.5 incorrect,
    # plus small deterministic noise.
    last_layer_w = (proto_class_id.T * 1.0 + (1.0 - proto_class_id.T) * (-0.5)
                    + 0.01 * jax.random.normal(k4, (C, P), dtype=jnp.float32))

    # p_tile=8 -> grid=(3,), last block ragged (20 % 8 != 0): exercises the
    # parallel multi-block path and the in-kernel validity masking.
    total_loss, loss_terms = protopnet_loss_forward(
        target, logits, sim_maps, proto_class_id, last_layer_w,
        num_classes=C, p_tile=8)
    jax.block_until_ready(total_loss)

    # sanity-check the production auto tile chooser at realistic shapes
    tp_auto = _pick_p_tile(2000, 80, 200, 196, 2, _vmem_limit_bytes())
    assert tp_auto >= 8 and tp_auto % 8 == 0, tp_auto

    # --- pure-JAX reference (on the same bf16 sim values) ---
    t_oh = jax.nn.one_hot(target, C, dtype=jnp.float32)
    ref_ce = -jnp.mean(jnp.sum(t_oh * jax.nn.log_softmax(logits, axis=-1), axis=-1))
    sims = jnp.max(sim_maps.astype(jnp.float32), axis=-1)            # (B, P)
    same = t_oh @ proto_class_id.T
    ref_cluster = -jnp.mean(jnp.max(jnp.where(same > 0.5, sims, -1e9), axis=-1))
    ref_sep = jnp.mean(jnp.max(jnp.where(same > 0.5, -1e9, sims), axis=-1))
    ref_l1 = jnp.sum(jnp.abs(last_layer_w) * (1.0 - proto_class_id.T))
    ref = {"cross_entropy": ref_ce, "cluster": ref_cluster,
           "separation": ref_sep, "l1": ref_l1}
    ref_total = (ref_ce * BATCH_LOSS_COEFS["cross_entropy"]
                 + ref_cluster * BATCH_LOSS_COEFS["cluster"]
                 + ref_sep * BATCH_LOSS_COEFS["separation"]
                 + ref_l1 * MODEL_LOSS_COEFS["l1"])

    for name, rv in ref.items():
        assert abs(float(loss_terms[name]) - float(rv)) < 5e-4, (
            name, float(loss_terms[name]), float(rv))
    assert abs(float(total_loss) - float(ref_total)) < 5e-4, (
        float(total_loss), float(ref_total))

    print("KERNEL_OK")
</pallas_src>

<mosaic_0001>
module attributes {stable_mosaic.version = 11 : i64} {
  func.func @_proto_loss_kernel(%arg0: i32, %arg1: memref<8x4xf32, #tpu.memory_space<vmem>>, %arg2: memref<8x4xf32, #tpu.memory_space<vmem>>, %arg3: memref<8x8x1xf32, #tpu.memory_space<vmem>>, %arg4: memref<8x8x49xbf16, #tpu.memory_space<vmem>>, %arg5: memref<8x4xf32, #tpu.memory_space<vmem>>, %arg6: memref<8x4xf32, #tpu.memory_space<vmem>>, %arg7: memref<1x8x128xf32, #tpu.memory_space<vmem>>) attributes {dimension_semantics = [#tpu.dimension_semantics<parallel>], iteration_bounds = array<i64: 3>, scalar_prefetch = 0 : i64, scratch_operands = 0 : i64, tpu.core_type = #tpu.core_type<tc>, window_params = [{pipeline_mode = #tpu.pipeline_mode<synchronous>, transform_indices = @transform_0, window_bounds = array<i64: 8, 4>}, {pipeline_mode = #tpu.pipeline_mode<synchronous>, transform_indices = @transform_1, window_bounds = array<i64: 8, 4>}, {transform_indices = @transform_2, window_bounds = array<i64: 8, 8, 1>}, {transform_indices = @transform_3, window_bounds = array<i64: 8, 8, 49>}, {transform_indices = @transform_4, window_bounds = array<i64: 8, 4>}, {transform_indices = @transform_5, window_bounds = array<i64: 8, 4>}, {transform_indices = @transform_6, window_bounds = array<i64: 1, 8, 128>}]} {
    %c0 = arith.constant 0 : index
    %c0_0 = arith.constant 0 : index
    %c0_1 = arith.constant 0 : index
    %0 = vector.load %arg4[%c0, %c0_0, %c0_1] : memref<8x8x49xbf16, #tpu.memory_space<vmem>>, vector<8x8x49xbf16>
    %cst = arith.constant dense<0xFF80> : vector<8x8xbf16>
    %1 = vector.multi_reduction <maximumf>, %0, %cst [2] : vector<8x8x49xbf16> to vector<8x8xbf16>
    %2 = vector.shape_cast %1 : vector<8x8xbf16> to vector<8x8x1xbf16>
    %3 = arith.extf %2 : vector<8x8x1xbf16> to vector<8x8x1xf32>
    %c0_2 = arith.constant 0 : index
    %c0_3 = arith.constant 0 : index
    %c0_4 = arith.constant 0 : index
    %4 = vector.load %arg3[%c0_2, %c0_3, %c0_4] : memref<8x8x1xf32, #tpu.memory_space<vmem>>, vector<8x8x1xf32>
    %cst_5 = arith.constant 5.000000e-01 : f32
    %5 = vector.broadcast %cst_5 : f32 to vector<8x8x1xf32>
    %6 = arith.cmpf ogt, %4, %5 : vector<8x8x1xf32>
    %cst_6 = arith.constant -1.000000e+09 : f32
    %7 = vector.broadcast %cst_6 : f32 to vector<8x8x1xf32>
    %8 = arith.select %6, %3, %7 : vector<8x8x1xi1>, vector<8x8x1xf32>
    %cst_7 = arith.constant 5.000000e-01 : f32
    %9 = vector.broadcast %cst_7 : f32 to vector<8x8x1xf32>
    %10 = arith.cmpf ogt, %4, %9 : vector<8x8x1xf32>
    %cst_8 = arith.constant -1.000000e+09 : f32
    %11 = vector.broadcast %cst_8 : f32 to vector<8x8x1xf32>
    %12 = arith.select %10, %11, %3 : vector<8x8x1xi1>, vector<8x8x1xf32>
    %13 = tpu.iota {dimensions = array<i32: 1>} : vector<8x8x1xi32>
    %c8_i32 = arith.constant 8 : i32
    %14 = arith.muli %arg0, %c8_i32 : i32
    %c20_i32 = arith.constant 20 : i32
    %15 = arith.subi %c20_i32, %14 : i32
    %16 = vector.broadcast %15 : i32 to vector<8x8x1xi32>
    %17 = arith.cmpi slt, %13, %16 : vector<8x8x1xi32>
    %cst_9 = arith.constant -1.000000e+09 : f32
    %18 = vector.broadcast %cst_9 : f32 to vector<8x8x1xf32>
    %19 = arith.select %17, %8, %18 : vector<8x8x1xi1>, vector<8x8x1xf32>
    %cst_10 = arith.constant -1.000000e+09 : f32
    %20 = vector.broadcast %cst_10 : f32 to vector<8x8x1xf32>
    %21 = arith.select %17, %12, %20 : vector<8x8x1xi1>, vector<8x8x1xf32>
    %cst_11 = arith.constant dense<0xFF800000> : vector<8x1xf32>
    %22 = vector.multi_reduction <maximumf>, %19, %cst_11 [1] : vector<8x8x1xf32> to vector<8x1xf32>
    %cst_12 = arith.constant dense<0xFF800000> : vector<8x1xf32>
    %23 = vector.multi_reduction <maximumf>, %21, %cst_12 [1] : vector<8x8x1xf32> to vector<8x1xf32>
    %c0_13 = arith.constant 0 : index
    %c0_14 = arith.constant 0 : index
    %24 = vector.load %arg5[%c0_13, %c0_14] : memref<8x4xf32, #tpu.memory_space<vmem>>, vector<8x4xf32>
    %25 = math.absf %24 : vector<8x4xf32>
    %c0_15 = arith.constant 0 : index
    %c0_16 = arith.constant 0 : index
    %26 = vector.load %arg6[%c0_15, %c0_16] : memref<8x4xf32, #tpu.memory_space<vmem>>, vector<8x4xf32>
    %cst_17 = arith.constant 1.000000e+00 : f32
    %27 = vector.broadcast %cst_17 : f32 to vector<8x4xf32>
    %28 = arith.subf %27, %26 : vector<8x4xf32>
    %29 = arith.mulf %25, %28 : vector<8x4xf32>
    %30 = tpu.iota {dimensions = array<i32: 0>} : vector<8x4xi32>
    %c8_i32_18 = arith.constant 8 : i32
    %31 = arith.muli %arg0, %c8_i32_18 : i32
    %c20_i32_19 = arith.constant 20 : i32
    %32 = arith.subi %c20_i32_19, %31 : i32
    %33 = vector.broadcast %32 : i32 to vector<8x4xi32>
    %34 = arith.cmpi slt, %30, %33 : vector<8x4xi32>
    %cst_20 = arith.constant 0.000000e+00 : f32
    %35 = vector.broadcast %cst_20 : f32 to vector<8x4xf32>
    %36 = arith.select %34, %29, %35 : vector<8x4xi1>, vector<8x4xf32>
    %37 = vector.shape_cast %36 : vector<8x4xf32> to vector<1x8x4xf32>
    %cst_21 = arith.constant dense<0.000000e+00> : vector<1xf32>
    %38 = vector.multi_reduction <add>, %37, %cst_21 [1, 2] : vector<1x8x4xf32> to vector<1xf32>
    %39 = vector.shape_cast %38 : vector<1xf32> to vector<1x1x1xf32>
    %40 = vector.extract %39[0, 0, 0] : f32 from vector<1x1x1xf32>
    %41 = vector.broadcast %40 : f32 to vector<1x1xf32>
    %c0_22 = arith.constant 0 : index
    %c0_23 = arith.constant 0 : index
    %42 = vector.load %arg1[%c0_22, %c0_23] : memref<8x4xf32, #tpu.memory_space<vmem>>, vector<8x4xf32>
    %c0_24 = arith.constant 0 : index
    %c0_25 = arith.constant 0 : index
    %43 = vector.load %arg2[%c0_24, %c0_25] : memref<8x4xf32, #tpu.memory_space<vmem>>, vector<8x4xf32>
    %cst_26 = arith.constant dense<0xFF800000> : vector<8xf32>
    %44 = vector.multi_reduction <maximumf>, %42, %cst_26 [1] : vector<8x4xf32> to vector<8xf32>
    %45 = vector.shape_cast %44 : vector<8xf32> to vector<8x1xf32>
    %46 = vector.broadcast %45 : vector<8x1xf32> to vector<8x4xf32>
    %47 = arith.subf %42, %46 : vector<8x4xf32>
    %48 = math.exp %47 : vector<8x4xf32>
    %cst_27 = arith.constant dense<0.000000e+00> : vector<8xf32>
    %49 = vector.multi_reduction <add>, %48, %cst_27 [1] : vector<8x4xf32> to vector<8xf32>
    %50 = vector.shape_cast %49 : vector<8xf32> to vector<8x1xf32>
    %51 = math.log %50 : vector<8x1xf32>
    %52 = vector.broadcast %51 : vector<8x1xf32> to vector<8x4xf32>
    %53 = arith.subf %52, %47 : vector<8x4xf32>
    %54 = arith.mulf %43, %53 : vector<8x4xf32>
    %cst_28 = arith.constant dense<0.000000e+00> : vector<8xf32>
    %55 = vector.multi_reduction <add>, %54, %cst_28 [1] : vector<8x4xf32> to vector<8xf32>
    %56 = vector.shape_cast %55 : vector<8xf32> to vector<8x1xf32>
    %57 = tpu.iota {dimensions = array<i32: 1>} : vector<8x128xi32>
    %c0_i32 = arith.constant 0 : i32
    %58 = vector.broadcast %c0_i32 : i32 to vector<8x128xi32>
    %59 = arith.cmpi eq, %57, %58 : vector<8x128xi32>
    %cst_29 = arith.constant 0.000000e+00 : f32
    %60 = vector.shape_cast %22 : vector<8x1xf32> to vector<8x1xf32>
    %61 = vector.broadcast %60 : vector<8x1xf32> to vector<8x128xf32>
    %62 = vector.broadcast %cst_29 : f32 to vector<8x128xf32>
    %63 = arith.select %59, %61, %62 : vector<8x128xi1>, vector<8x128xf32>
    %c1_i32 = arith.constant 1 : i32
    %64 = vector.broadcast %c1_i32 : i32 to vector<8x128xi32>
    %65 = arith.cmpi eq, %57, %64 : vector<8x128xi32>
    %cst_30 = arith.constant 0.000000e+00 : f32
    %66 = vector.shape_cast %23 : vector<8x1xf32> to vector<8x1xf32>
    %67 = vector.broadcast %66 : vector<8x1xf32> to vector<8x128xf32>
    %68 = vector.broadcast %cst_30 : f32 to vector<8x128xf32>
    %69 = arith.select %65, %67, %68 : vector<8x128xi1>, vector<8x128xf32>
    %70 = arith.addf %63, %69 : vector<8x128xf32>
    %c2_i32 = arith.constant 2 : i32
    %71 = vector.broadcast %c2_i32 : i32 to vector<8x128xi32>
    %72 = arith.cmpi eq, %57, %71 : vector<8x128xi32>
    %cst_31 = arith.constant 0.000000e+00 : f32
    %73 = vector.shape_cast %41 : vector<1x1xf32> to vector<1x1xf32>
    %74 = vector.broadcast %73 : vector<1x1xf32> to vector<8x128xf32>
    %75 = vector.broadcast %cst_31 : f32 to vector<8x128xf32>
    %76 = arith.select %72, %74, %75 : vector<8x128xi1>, vector<8x128xf32>
    %77 = arith.addf %70, %76 : vector<8x128xf32>
    %c3_i32 = arith.constant 3 : i32
    %78 = vector.broadcast %c3_i32 : i32 to vector<8x128xi32>
    %79 = arith.cmpi eq, %57, %78 : vector<8x128xi32>
    %cst_32 = arith.constant 0.000000e+00 : f32
    %80 = vector.shape_cast %56 : vector<8x1xf32> to vector<8x1xf32>
    %81 = vector.broadcast %80 : vector<8x1xf32> to vector<8x128xf32>
    %82 = vector.broadcast %cst_32 : f32 to vector<8x128xf32>
    %83 = arith.select %79, %81, %82 : vector<8x128xi1>, vector<8x128xf32>
    %84 = arith.addf %77, %83 : vector<8x128xf32>
    %c0_33 = arith.constant 0 : index
    %c0_34 = arith.constant 0 : index
    %c0_35 = arith.constant 0 : index
    %85 = vector.load %arg7[%c0_33, %c0_34, %c0_35] : memref<1x8x128xf32, #tpu.memory_space<vmem>>, vector<1x8x128xf32>
    %86 = vector.shape_cast %85 : vector<1x8x128xf32> to vector<8x128xf32>
    %87 = vector.shape_cast %84 : vector<8x128xf32> to vector<1x8x128xf32>
    tpu.vector_store %arg7[%c0_33, %c0_34, %c0_35], %87 {strides = array<i32>} : memref<1x8x128xf32, #tpu.memory_space<vmem>>, vector<1x8x128xf32>,
    return
  }
  func.func @transform_0(%arg0: i32) -> (i32, i32) {
    %c0_i32 = arith.constant 0 : i32
    %c0_i32_0 = arith.constant 0 : i32
    %c0_i32_1 = arith.constant 0 : i32
    return %c0_i32, %c0_i32_0 : i32, i32
  }
  func.func @transform_1(%arg0: i32) -> (i32, i32) {
    %c0_i32 = arith.constant 0 : i32
    %c0_i32_0 = arith.constant 0 : i32
    %c0_i32_1 = arith.constant 0 : i32
    return %c0_i32, %c0_i32_0 : i32, i32
  }
  func.func @transform_2(%arg0: i32) -> (i32, i32, i32) {
    %c0_i32 = arith.constant 0 : i32
    %c0_i32_0 = arith.constant 0 : i32
    %c0_i32_1 = arith.constant 0 : i32
    return %c0_i32, %arg0, %c0_i32_0 : i32, i32, i32
  }
  func.func @transform_3(%arg0: i32) -> (i32, i32, i32) {
    %c0_i32 = arith.constant 0 : i32
    %c0_i32_0 = arith.constant 0 : i32
    %c0_i32_1 = arith.constant 0 : i32
    return %c0_i32, %arg0, %c0_i32_0 : i32, i32, i32
  }
  func.func @transform_4(%arg0: i32) -> (i32, i32) {
    %c0_i32 = arith.constant 0 : i32
    %c0_i32_0 = arith.constant 0 : i32
    return %arg0, %c0_i32 : i32, i32
  }
  func.func @transform_5(%arg0: i32) -> (i32, i32) {
    %c0_i32 = arith.constant 0 : i32
    %c0_i32_0 = arith.constant 0 : i32
    return %arg0, %c0_i32 : i32, i32
  }
  func.func @transform_6(%arg0: i32) -> (i32, i32, i32) {
    %c0_i32 = arith.constant 0 : i32
    %c0_i32_0 = arith.constant 0 : i32
    %c0_i32_1 = arith.constant 0 : i32
    return %arg0, %c0_i32, %c0_i32_0 : i32, i32, i32
  }
}

</mosaic_0001>

<bundles_post_ra>
// kernel: protopnet_loss_forward.1
= control target key start
LH: loop header
LB: loop body
LE: loop exit
PB: predicated region body
PF: predicated region fallthrough
CT: control target
= control target key end

     0   :  { %s1012_s21 = smov 0   ;;  %s1014_s22 = smov 0   ;;  %s1202_s0 = inlined_call_operand.vmem [shape: f32[8,4], index: 0, kind: input, shape index: {}]   ;;  %s1203_s1 = inlined_call_operand.vmem [shape: f32[8,4], index: 1, kind: input, shape index: {}]   ;;  %s1204_s2 = inlined_call_operand.vmem [shape: f32[8,20,1], index: 2, kind: input, shape index: {}]   ;;  %s1205_s3 = inlined_call_operand.vmem [shape: bf16[8,20,49], index: 3, kind: input, shape index: {}]   ;;  %s1206_s4 = inlined_call_operand.vmem [shape: f32[20,4], index: 4, kind: input, shape index: {}]   ;;  %s1207_s5 = inlined_call_operand.vmem [shape: f32[20,4], index: 5, kind: input, shape index: {}]   ;;  %s1208_s6 = inlined_call_operand.vmem [shape: f32[3,8,128], index: 6, kind: output, shape index: {}]  }
   0x1   :  { %s1016_s23 = smov 0  }
   0x2 LB: > { %s1028_s24 = sadd.s32 4294967295, %s974_s23   ;;  %s1031_s25 = sadd.s32 1, %s974_s23   ;;  %s974_s23 = sphi %s1016_s23, %s1214_s23   ;;  %s970_s22 = sphi %s1014_s22, %s1213_s22   ;;  %s966_s21 = sphi %s1012_s21, %s1212_s21  }
   0x3   : > { %s62_s26 = ssub.s32 %s974_s23, %s1031_s25  ;;  %s65_s27 = sadd.s32 1, %s970_s22 }
   0x4   : > { %p63_p0 = scmp.eq.s32.totalorder %s62_s26, 0  ;;  %p72_p1 = scmp.ne.s32.totalorder %s970_s22, %s966_s21 }
   0x5   : > { %p73_p2 = scmp.eq.s32.totalorder %s974_s23, 0  ;;  %p905_p4 = scmp.ge.s32.totalorder %s974_s23, 3 }
   0x6   : > { %s1040_s28 = scalar_select %p63_p0, %s970_s22, %s65_s27  }
   0x7   : > { %p1042_p3 = por %p73_p2, %p72_p1  ;;  %208 = sbr.rel (%p905_p4) target bundleno = 29 (0x1d), region = 24 }
   0xc   : > { %211 = sbr.rel (!%p1042_p3) target bundleno = 20 (0x14), region = 28  ;;  %s213_s30 = sand.u32 (%p1042_p3), 1, %s970_s22  }
   0xd   : > { %s907_s7 = sshll.u32 (%p1042_p3), %s974_s23, 3  ;;  %s906_s8 = sshll.u32 (%p1042_p3), %s213_s30, 6 }
   0xe   : > { %s217_s11 = scalar_lea.vmem (%p1042_p3), %s1204_s2, %s907_s7  ;;  %s215_s12 = scalar_lea.vmem (%p1042_p3), [#allocation2], %s906_s8 }
   0xf   : > { %v260_v0 = vld [vmem:[%s217_s11] sm:$0xff] (%p1042_p3)  ;;  %v262_v1 = vld [vmem:[%s217_s11 + $0x18] sm:$0xff] (%p1042_p3)  ;;  %v264_v2 = vld [vmem:[%s217_s11 + $0x30] sm:$0xff] (%p1042_p3) }
  0x10   : > { %261 = vst [vmem:[%s215_s12] sm:$0xff] (%p1042_p3), %v260_v0  ;;  %263 = vst [vmem:[%s215_s12 + $0x8] sm:$0xff] (%p1042_p3), %v262_v1  ;;  %v266_v3 = vld [vmem:[%s217_s11 + $0x48] sm:$0xff] (%p1042_p3)  ;;  %v268_v4 = vld [vmem:[%s217_s11 + $0x60] sm:$0xff] (%p1042_p3) }
  0x11   : > { %265 = vst [vmem:[%s215_s12 + $0x10] sm:$0xff] %v264_v2  ;;  %v270_v5 = vld [vmem:[%s217_s11 + $0x78] sm:$0xff]  ;;  %267 = vst [vmem:[%s215_s12 + $0x18] sm:$0xff] %v266_v3  ;;  %v272_v6 = vld [vmem:[%s217_s11 + $0x90] sm:$0xff] }
  0x12   : > { %269 = vst [vmem:[%s215_s12 + $0x20] sm:$0xff] %v268_v4  ;;  %271 = vst [vmem:[%s215_s12 + $0x28] sm:$0xff] %v270_v5  ;;  %v274_v7 = vld [vmem:[%s217_s11 + $0xa8] sm:$0xff] }
  0x13   : > { %273 = vst [vmem:[%s215_s12 + $0x30] sm:$0xff] %v272_v6  ;;  %275 = vst [vmem:[%s215_s12 + $0x38] sm:$0xff] %v274_v7 }
  0x14 PF: > { %281 = sbr.rel (!%p1042_p3) target bundleno = 29 (0x1d), region = 66  ;;  %s283_s13 = sand.u32 (%p1042_p3), 1, %s970_s22  }
  0x15   : > { %s909_s14 = sshll.u32 (%p1042_p3), %s974_s23, 2  ;;  %s908_s15 = sshll.u32 (%p1042_p3), %s283_s13, 5 }
  0x16   : > { %s287_s18 = scalar_lea.vmem (%p1042_p3), %s1205_s3, %s909_s14  ;;  %s285_s19 = scalar_lea.vmem (%p1042_p3), [#allocation3], %s908_s15 }
  0x17   : > { %v304_v8 = vld [vmem:[%s287_s18] sm:$0xf] (%p1042_p3)  ;;  %v306_v9 = vld [vmem:[%s287_s18 + $0xc] sm:$0xf] (%p1042_p3)  ;;  %v308_v10 = vld [vmem:[%s287_s18 + $0x18] sm:$0xf] (%p1042_p3) }
  0x18   : > { %305 = vst [vmem:[%s285_s19] sm:$0xf] (%p1042_p3), %v304_v8  ;;  %307 = vst [vmem:[%s285_s19 + $0x4] sm:$0xf] (%p1042_p3), %v306_v9  ;;  %v310_v11 = vld [vmem:[%s287_s18 + $0x24] sm:$0xf] (%p1042_p3) }
  0x19   : > { %v312_v12 = vld [vmem:[%s287_s18 + $0x30] sm:$0xf]  ;;  %309 = vst [vmem:[%s285_s19 + $0x8] sm:$0xf] %v308_v10  ;;  %311 = vst [vmem:[%s285_s19 + $0xc] sm:$0xf] %v310_v11 }
  0x1a   : > { %313 = vst [vmem:[%s285_s19 + $0x10] sm:$0xf] %v312_v12  ;;  %v314_v13 = vld [vmem:[%s287_s18 + $0x3c] sm:$0xf]  ;;  %v316_v14 = vld [vmem:[%s287_s18 + $0x48] sm:$0xf] }
  0x1b   : > { %v318_v15 = vld [vmem:[%s287_s18 + $0x54] sm:$0xf]  ;;  %315 = vst [vmem:[%s285_s19 + $0x14] sm:$0xf] %v314_v13  ;;  %317 = vst [vmem:[%s285_s19 + $0x18] sm:$0xf] %v316_v14 }
  0x1c   : > { %319 = vst [vmem:[%s285_s19 + $0x1c] sm:$0xf] %v318_v15 }
  0x1d PF: > { %p910_p5 = scmp.ge.s32.totalorder %s974_s23, 1  ;;  %p372_p6 = scmp.lt.s32.totalorder %s974_s23, 4 }
  0x1f   : > { %p373_p7 = pnand %p910_p5, %p372_p6 }
  0x20   : > { %s379_s27 = sand.u32 (!%p373_p7), 1, %s966_s21   ;;  %p426_p8 = scmp.lt.s32.totalorder (!%p373_p7), %s1028_s24, 2 }
  0x21   : > { %376 = sbr.rel (%p373_p7) target bundleno = 507 (0x1fb), region = 115  ;;  %s912_s29 = sshll.u32 (!%p373_p7), %s379_s27, 5 }
  0x22   : > { %s388_s30 = scalar_lea.vmem (!%p373_p7), [#allocation3], %s912_s29  ;;  %s916_s23 = sshll.u32 (!%p373_p7), %s1028_s24, 3 }
  0x23   : > { %s532_s7 = ssub.s32 (!%p373_p7), 20, %s916_s23 }
  0x26   : > { %vm670_vm0 = vcmask 31744   ;;  %v681_v16 = vld [vmem:[%s1202_s0] sm:$0xff]  ;;  %vm447_vm1 = vcmask 396288   ;;  %v441_v22 = vld [vmem:[%s388_s30 + $0x8] sm:$0xf]  ;;  %v976_v34 = vmov 0   ;;  %v529_v35 = vlaneseq }
  0x27   : > { %v683_v17 = vsel %vm670_vm0, %v681_v16, -inf  ;;  %v440_v18 = vld [vmem:[%s388_s30 + $0x4] sm:$0xf]  ;;  %v439_v19 = vld [vmem:[%s388_s30] sm:$0xf]  ;;  %947 = vset.pattern.permute.xlu1 %v976_v34  ;;  %946 = vset.pattern.permute.xlu0 %v976_v34  ;;  %s1216_s24 = smov (!%p426_p8, %s1028_s24), 2  ;;  %v533_v39 = vstv %s532_s7 }
  0x28   : > { %684 = vmax.xlane.f32.xlu0 %v683_v17  ;;  %v455_v20 = vsel %vm447_vm1, %v440_v18, 4286644096  ;;  %v450_v21 = vsel %vm447_vm1, %v439_v19, 4286644096  ;;  %v442_v23 = vld [vmem:[%s388_s30 + $0xc] sm:$0xf] }
  0x29   : > { %457 = vmax.xlane.bf16.xlu1 %v455_v20  ;;  %v460_v24 = vsel %vm447_vm1, %v441_v22, 4286644096  ;;  %v465_v25 = vsel %vm447_vm1, %v442_v23, 4286644096  ;;  %v444_v26 = vld [vmem:[%s388_s30 + $0x14] sm:$0xf] }
  0x2a   : > { %v443_v27 = vld [vmem:[%s388_s30 + $0x10] sm:$0xf]  ;;  %v475_v28 = vsel %vm447_vm1, %v444_v26, 4286644096  ;;  %v446_v30 = vld [vmem:[%s388_s30 + $0x1c] sm:$0xf] }
  0x2b   : > { %v470_v29 = vsel %vm447_vm1, %v443_v27, 4286644096  ;;  %v445_v31 = vld [vmem:[%s388_s30 + $0x18] sm:$0xf]  ;;  %v485_v32 = vsel %vm447_vm1, %v446_v30, 4286644096 }
  0x2c   : > { %452 = vmax.xlane.bf16.xlu0 %v450_v21  ;;  %v480_v33 = vsel %vm447_vm1, %v445_v31, 4286644096  ;;  %s1081_s8 = sshll.u32 %s1216_s24, 3  ;;  %v530_v36 = vshrl.u32 %v529_v35, 7  ;;  %s911_s24 = sshll.u32 %s379_s27, 6  ;;  %vm551_vm4 = vcmask 7168  }
  0x2d   : > { %s429_s11 = scalar_lea.vmem %s1206_s4, %s1081_s8  ;;  %s433_s14 = scalar_lea.vmem %s1207_s5, %s1081_s8  ;;  %vm734_vm12 = vcmask 1041409   ;;  %vm736_vm13 = vcmask 1042434   ;;  %vm738_vm14 = vcmask 1043459   ;;  %vm740_vm15 = vcmask 1044484  }
  0x2e   : > { %v664_v37 = vld [vmem:[%s429_s11] sm:$0xff]  ;;  %vm1092_vm2 = vcmp.lt.s32.totalorder %v530_v36, %v533_v39  ;;  %s1104_s15 = scalar_lea.vmem [#allocation2], %s911_s24  ;;  %vm744_vm1 = vcmask 1046534   ;;  %s437_s20 = scalar_lea.vmem %s1208_s6, %s1081_s8 }
  0x2f   : > { %v666_v38 = vld [vmem:[%s433_s14] sm:$0xff]  ;;  %v665_v40 = vand.u32 2147483647, %v664_v37  ;;  %v498_v49 = vld [vmem:[%s1104_s15 + $0x8] sm:$0xff]  ;;  %v499_v61 = vld [vmem:[%s1104_s15 + $0x10] sm:$0xff] }
  0x30   : > { %v667_v41 = vsub.f32 1.0, %v666_v38  ;;  %v497_v50 = vld [vmem:[%s1104_s15] sm:$0xff]  ;;  %vm506_vm3 = vcmp.gt.f32.partialorder %v498_v49, 0.5  ;;  %v500_v2 = vld [vmem:[%s1104_s15 + $0x18] sm:$0xff]  ;;  %vm507_vm6 = vcmp.gt.f32.partialorder %v499_v61, 0.5  ;;  %v1136_v30 = vld [vmem:[%s1104_s15 + $0x30] sm:$0xff] }
  0x31   : > { %462 = vmax.xlane.bf16.xlu1 %v460_v24  ;;  %vm505_vm5 = vcmp.gt.f32.partialorder %v497_v50, 0.5  ;;  %vm508_vm7 = vcmp.gt.f32.partialorder %v500_v2, 0.5  ;;  %v501_v22 = vld [vmem:[%s1104_s15 + $0x20] sm:$0xff]  ;;  %vm511_vm10 = vcmp.gt.f32.partialorder %v1136_v30, 0.5 }
  0x32   : > { %v668_v42 = vmul.f32 %v667_v41, %v665_v40  ;;  %vm509_vm8 = vcmp.gt.f32.partialorder %v501_v22, 0.5 }
  0x34   : > { %467 = vmax.xlane.bf16.xlu0 %v465_v25  ;;  %v669_v44 = vsel %vm1092_vm2, %v668_v42, 0.0 }
  0x35   : > { %v671_v45 = vsel %vm670_vm0, %v669_v44, 0.0 }
  0x39   : > { %477 = vmax.xlane.bf16.xlu1 %v475_v28 }
  0x3c   : > { %472 = vmax.xlane.bf16.xlu0 %v470_v29  ;;  %v502_v29 = vld [vmem:[%s1104_s15 + $0x28] sm:$0xff] }
  0x3d   : > { %vm510_vm9 = vcmp.gt.f32.partialorder %v502_v29, 0.5 }
  0x41   : > { %487 = vmax.xlane.bf16.xlu1 %v485_v32 }
  0x44   : > { %482 = vmax.xlane.bf16.xlu0 %v480_v33 }
  0x4c   : > { %672 = vadd.xlane.f32.xlu0 %v671_v45 }
  0xb1   : > { %v685_v46 = vpop.xlane.xlu0 %684 }
  0xb2   : > { %v1101_v47 = vsub.f32 %v681_v16, %v685_v46 }
  0xb4   : > { %v687_v48 = vmul.f32 1.442695, %v1101_v47 }
  0xb6   : > { %948 = vpow2.f32 %v687_v48  ;;  %v458_v51 = vpop.xlane.xlu1 %457 }
  0xb7   : > { %v490_v52 = vunpack.c.l.bf16 %v458_v51 }
  0xb9   : > { %v453_v53 = vpop.xlane.xlu0 %452  ;;  %v514_v55 = vsel %vm506_vm3, %v490_v52, -1e+09  ;;  %v522_v56 = vsel %vm506_vm3, -1e+09, %v490_v52 }
  0xba   : > { %v489_v54 = vunpack.c.l.bf16 %v453_v53  ;;  %v536_v57 = vsel %vm1092_vm2, %v514_v55, -1e+09  ;;  %v544_v58 = vsel %vm1092_vm2, %v522_v56, -1e+09  ;;  %v504_v55 = vld [vmem:[%s1104_s15 + $0x38] sm:$0xff] }
  0xbb   : > { %v559_v59 = vsel %vm551_vm4, %v536_v57, -inf  ;;  %v615_v3 = vsel %vm551_vm4, %v544_v58, -inf  ;;  %vm512_vm11 = vcmp.gt.f32.partialorder %v504_v55, 0.5 }
  0xbc   : > { %v521_v60 = vsel %vm505_vm5, -1e+09, %v489_v54  ;;  %v560_v62 = vrot.slane %v559_v59, 4  ;;  %v513_v0 = vsel %vm505_vm5, %v489_v54, -1e+09  ;;  %v616_v12 = vrot.slane %v615_v3, 4 }
  0xbd   : > { %v543_v63 = vsel %vm1092_vm2, %v521_v60, -1e+09  ;;  %v535_v9 = vsel %vm1092_vm2, %v513_v0, -1e+09 }
  0xbe   : > { %v608_v1 = vsel %vm551_vm4, %v543_v63, -inf  ;;  %v463_v5 = vpop.xlane.xlu1 %462  ;;  %v561_v6 = vmax.f32 %v559_v59, %v560_v62  ;;  %v552_v23 = vsel %vm551_vm4, %v535_v9, -inf  ;;  %v617_v27 = vmax.f32 %v615_v3, %v616_v12 }
  0xbf   : > { %v609_v4 = vrot.slane %v608_v1, 4  ;;  %v491_v7 = vunpack.c.l.bf16 %v463_v5  ;;  %v553_v34 = vrot.slane %v552_v23, 4 }
  0xc0   : > { %v562_v19 = vrot.slane %v561_v6, 2  ;;  %v618_v41 = vrot.slane %v617_v27, 2 }
  0xc1   : > { %v468_v8 = vpop.xlane.xlu0 %467  ;;  %v610_v13 = vmax.f32 %v608_v1, %v609_v4  ;;  %v515_v14 = vsel %vm507_vm6, %v491_v7, -1e+09  ;;  %v523_v15 = vsel %vm507_vm6, -1e+09, %v491_v7  ;;  %v554_v51 = vmax.f32 %v552_v23, %v553_v34 }
  0xc2   : > { %v492_v10 = vunpack.c.l.bf16 %v468_v8  ;;  %v537_v17 = vsel %vm1092_vm2, %v515_v14, -1e+09  ;;  %v545_v18 = vsel %vm1092_vm2, %v523_v15, -1e+09  ;;  %v563_v37 = vmax.f32 %v561_v6, %v562_v19 }
  0xc3   : > { %v949_v11 = vpop.eup %948  ;;  %v566_v20 = vsel %vm551_vm4, %v537_v17, -inf  ;;  %v622_v24 = vsel %vm551_vm4, %v545_v18, -inf  ;;  %v611_v28 = vrot.slane %v610_v13, 2  ;;  %v619_v62 = vmax.f32 %v617_v27, %v618_v41 }
  0xc4   : > { %v689_v16 = vsel %vm670_vm0, %v949_v11, 0.0  ;;  %v516_v21 = vsel %vm508_vm7, %v492_v10, -1e+09  ;;  %v524_v25 = vsel %vm508_vm7, -1e+09, %v492_v10  ;;  %v567_v31 = vrot.slane %v566_v20, 4 }
  0xc5   : > { %690 = vadd.xlane.f32.xlu1 %v689_v16  ;;  %v538_v26 = vsel %vm1092_vm2, %v516_v21, -1e+09  ;;  %v546_v32 = vsel %vm1092_vm2, %v524_v25, -1e+09  ;;  %v623_v36 = vrot.slane %v622_v24, 4  ;;  %v612_v44 = vmax.f32 %v610_v13, %v611_v28 }
  0xc6   : > { %v478_v33 = vpop.xlane.xlu1 %477  ;;  %v573_v38 = vsel %vm551_vm4, %v538_v26, -inf  ;;  %v629_v42 = vsel %vm551_vm4, %v546_v32, -inf  ;;  %v568_v46 = vmax.f32 %v566_v20, %v567_v31  ;;  %v564_v53 = vrot.slane %v563_v37, 1 }
  0xc7   : > { %v494_v45 = vunpack.c.l.bf16 %v478_v33  ;;  %v574_v48 = vrot.slane %v573_v38, 4  ;;  %v624_v52 = vmax.f32 %v622_v24, %v623_v36  ;;  %v630_v56 = vrot.slane %v629_v42, 4 }
  0xc8   : > { %v613_v60 = vrot.slane %v612_v44, 1  ;;  %v569_v0 = vrot.slane %v568_v46, 2  ;;  %v555_v4 = vrot.slane %v554_v51, 2  ;;  %v565_v5 = vmax.f32 %v563_v37, %v564_v53 }
  0xc9   : > { %v473_v39 = vpop.xlane.xlu0 %472  ;;  %v526_v59 = vsel %vm510_vm9, -1e+09, %v494_v45  ;;  %v575_v1 = vmax.f32 %v573_v38, %v574_v48  ;;  %v518_v10 = vsel %vm510_vm9, %v494_v45, -1e+09  ;;  %v625_v13 = vrot.slane %v624_v52, 2 }
  0xca   : > { %v493_v40 = vunpack.c.l.bf16 %v473_v39  ;;  %v548_v63 = vsel %vm1092_vm2, %v526_v59, -1e+09  ;;  %v631_v14 = vmax.f32 %v629_v42, %v630_v56  ;;  %v614_v15 = vmax.f32 %v612_v44, %v613_v60 }
  0xcb   : > { %v643_v2 = vsel %vm551_vm4, %v548_v63, -inf  ;;  %v620_v16 = vrot.slane %v619_v62, 1  ;;  %v576_v17 = vrot.slane %v575_v1, 2  ;;  %v570_v18 = vmax.f32 %v568_v46, %v569_v0 }
  0xcc   : > { %v517_v49 = vsel %vm509_vm8, %v493_v40, -1e+09  ;;  %v525_v50 = vsel %vm509_vm8, -1e+09, %v493_v40  ;;  %v644_v7 = vrot.slane %v643_v2, 4  ;;  %v556_v38 = vmax.f32 %v554_v51, %v555_v4 }
  0xcd   : > { %v547_v54 = vsel %vm1092_vm2, %v525_v50, -1e+09  ;;  %v539_v57 = vsel %vm1092_vm2, %v517_v49, -1e+09  ;;  %v540_v22 = vsel %vm1092_vm2, %v518_v10, -1e+09  ;;  %v626_v41 = vmax.f32 %v624_v52, %v625_v13 }
  0xce   : > { %v636_v58 = vsel %vm551_vm4, %v547_v54, -inf  ;;  %v488_v3 = vpop.xlane.xlu1 %487  ;;  %v580_v6 = vsel %vm551_vm4, %v539_v57, -inf  ;;  %v645_v23 = vmax.f32 %v643_v2, %v644_v7  ;;  %v587_v34 = vsel %vm551_vm4, %v540_v22, -inf }
  0xcf   : > { %v637_v61 = vrot.slane %v636_v58, 4  ;;  %v496_v12 = vunpack.c.l.bf16 %v488_v3  ;;  %v581_v21 = vrot.slane %v580_v6, 4  ;;  %v571_v36 = vrot.slane %v570_v18, 1 }
  0xd0   : > { %v646_v39 = vrot.slane %v645_v23, 2  ;;  %v621_v30 = vmax.f32 %v619_v62, %v620_v16  ;;  %v557_v45 = vrot.slane %v556_v38, 1  ;;  %v632_v48 = vrot.slane %v631_v14, 2 }
  0xd1   : > { %v483_v8 = vpop.xlane.xlu0 %482  ;;  %v638_v9 = vmax.f32 %v636_v58, %v637_v61  ;;  %v520_v20 = vsel %vm512_vm11, %v496_v12, -1e+09  ;;  %v528_v27 = vsel %vm512_vm11, -1e+09, %v496_v12  ;;  %v582_v53 = vmax.f32 %v580_v6, %v581_v21 }
  0xd2   : > { %v495_v11 = vunpack.c.l.bf16 %v483_v8  ;;  %v542_v28 = vsel %vm1092_vm2, %v520_v20, -1e+09  ;;  %v550_v32 = vsel %vm1092_vm2, %v528_v27, -1e+09  ;;  %v588_v54 = vrot.slane %v587_v34, 4 }
  0xd3   : > { %v639_v25 = vrot.slane %v638_v9, 2  ;;  %v1173_v33 = vsel %vm551_vm4, %v542_v28, -inf  ;;  %v657_v37 = vsel %vm551_vm4, %v550_v32, -inf  ;;  %v558_v55 = vmax.f32 %v556_v38, %v557_v45 }
  0xd4   : > { %v527_v19 = vsel %vm511_vm10, -1e+09, %v495_v11  ;;  %v519_v29 = vsel %vm511_vm10, %v495_v11, -1e+09  ;;  %v658_v42 = vrot.slane %v657_v37, 4  ;;  %v572_v57 = vmax.f32 %v570_v18, %v571_v36 }
  0xd5   : > { %v549_v24 = vsel %vm1092_vm2, %v527_v19, -1e+09  ;;  %v541_v44 = vsel %vm1092_vm2, %v519_v29, -1e+09  ;;  %v640_v46 = vmax.f32 %v638_v9, %v639_v25  ;;  %v627_v58 = vrot.slane %v626_v41, 1  ;;  %704 = vperm.xlu0 %946, %v558_v55   ;;  %v673_v25 = vpop.xlane.xlu0 %672 }
  0xd6   : > { %708 = vperm.xlu1 %947, %v565_v5   ;;  %v650_v26 = vsel %vm551_vm4, %v549_v24, -inf  ;;  %v659_v50 = vmax.f32 %v657_v37, %v658_v42  ;;  %v594_v51 = vsel %vm551_vm4, %v541_v44, -inf  ;;  %v647_v52 = vmax.f32 %v645_v23, %v646_v39  ;;  %v682_v39 = vld [vmem:[%s1203_s1] sm:$0xff] }
  0xd7   : > { %v651_v31 = vrot.slane %v650_v26, 4  ;;  %v641_v56 = vrot.slane %v640_v46, 1  ;;  %v577_v60 = vmax.f32 %v575_v1, %v576_v17  ;;  %v583_v63 = vrot.slane %v582_v53, 2 }
  0xd8   : > { %v660_v59 = vrot.slane %v659_v50, 2  ;;  %v648_v62 = vrot.slane %v647_v52, 1  ;;  %v589_v0 = vmax.f32 %v587_v34, %v588_v54  ;;  %v595_v2 = vrot.slane %v594_v51, 4 }
  0xd9   : > { %v652_v40 = vmax.f32 %v650_v26, %v651_v31  ;;  %v642_v43 = vmax.f32 %v640_v46, %v641_v56  ;;  %v628_v3 = vmax.f32 %v626_v41, %v627_v58  ;;  %v633_v4 = vmax.f32 %v631_v14, %v632_v48 }
  0xda   : > { %753 = vperm.xlu1 %947, %v614_v15   ;;  %v578_v5 = vrot.slane %v577_v60, 1  ;;  %v649_v6 = vmax.f32 %v647_v52, %v648_v62  ;;  %v661_v8 = vmax.f32 %v659_v50, %v660_v59  ;;  %v590_v9 = vrot.slane %v589_v0, 2 }
  0xdb   : > { %v653_v49 = vrot.slane %v652_v40, 2  ;;  %769 = vperm.xlu0 %946, %v642_v43   ;;  %v596_v10 = vmax.f32 %v594_v51, %v595_v2  ;;  %v634_v11 = vrot.slane %v633_v4, 1  ;;  %v584_v12 = vmax.f32 %v582_v53, %v583_v63 }
  0xdc   : > { %v579_v1 = vmax.f32 %v577_v60, %v578_v5  ;;  %v662_v15 = vrot.slane %v661_v8, 1  ;;  %v591_v14 = vmax.f32 %v589_v0, %v590_v9  ;;  %v674_v27 = vrot.slane %v673_v25, 4 }
  0xdd   : > { %v654_v61 = vmax.f32 %v652_v40, %v653_v49  ;;  %v597_v16 = vrot.slane %v596_v10, 2  ;;  %v635_v17 = vmax.f32 %v633_v4, %v634_v11  ;;  %v585_v18 = vrot.slane %v584_v12, 1 }
  0xde   : > { %757 = vperm.xlu1 %947, %v621_v30   ;;  %v663_v19 = vmax.f32 %v661_v8, %v662_v15  ;;  %v592_v21 = vrot.slane %v591_v14, 1  ;;  %v675_v28 = vadd.f32 %v674_v27, %v673_v25  ;;  %v602_v40 = vrot.slane %v1173_v33, 4 }
  0xdf   : > { %v655_v7 = vrot.slane %v654_v61, 1  ;;  %773 = vperm.xlu0 %946, %v649_v6   ;;  %v586_v20 = vmax.f32 %v584_v12, %v585_v18  ;;  %v598_v22 = vmax.f32 %v596_v10, %v597_v16  ;;  %vm746_vm2 = vcmask 1047559  }
  0xe0   : > { %v593_v23 = vmax.f32 %v591_v14, %v592_v21  ;;  %v676_v29 = vrot.slane %v675_v28, 2  ;;  %v603_v30 = vmax.f32 %v1173_v33, %v602_v40 }
  0xe1   : > { %v656_v13 = vmax.f32 %v654_v61, %v655_v7  ;;  %v599_v24 = vrot.slane %v598_v22, 1  ;;  %v700_v7 = vand.u32 127, %v529_v35 }
  0xe2   : > { %712 = vperm.xlu1 %947, %v572_v57   ;;  %v677_v31 = vadd.f32 %v676_v29, %v675_v28  ;;  %v604_v45 = vrot.slane %v603_v30, 2 }
  0xe3   : > { %777 = vperm.xlu0 %946, %v656_v13   ;;  %v600_v26 = vmax.f32 %v598_v22, %v599_v24  ;;  %vm750_vm3 = vcmp.eq.s32.totalorder %v700_v7, 1  ;;  %vm701_vm4 = vcmp.eq.s32.totalorder %v700_v7, 0  ;;  %vm793_vm5 = vcmp.eq.s32.totalorder %v700_v7, 2 }
  0xe4   : > { %v678_v32 = vrot.slane %v677_v31, 1  ;;  %v605_v46 = vmax.f32 %v603_v30, %v604_v45  ;;  %vm797_vm6 = vcmp.eq.s32.totalorder %v700_v7, 3 }
  0xe6   : > { %761 = vperm.xlu1 %947, %v628_v3   ;;  %v679_v34 = vadd.f32 %v678_v32, %v677_v31  ;;  %v606_v48 = vrot.slane %v605_v46, 1 }
  0xe7   : > { %781 = vperm.xlu0 %946, %v663_v19  }
  0xe8   : > { %919 = vpush %v679_v34  ;;  %v607_v49 = vmax.f32 %v605_v46, %v606_v48 }
  0xea   : > { %716 = vperm.xlu1 %947, %v579_v1  }
  0xee   : > { %765 = vperm.xlu1 %947, %v635_v17  }
  0xf2   : > { %720 = vperm.xlu1 %947, %v586_v20  }
  0xf6   : > { %724 = vperm.xlu1 %947, %v593_v23  }
  0xfa   : > { %728 = vperm.xlu1 %947, %v600_v26  }
 0x119   : > { %s920_s17 = spop %919 }
 0x11a   : > { %v794_v15 = vstv %s920_s17 }
 0x11b   : > { %v795_v35 = vsel %vm793_vm5, %v794_v15, 0.0 }
 0x14e   : > { %v691_v36 = vpop.xlane.xlu1 %690 }
 0x14f   : > { %950 = vlog2.f32 %v691_v36 }
 0x150   : > { %v705_v51 = vpop.permute.xlu0 %704 }
 0x152   : > { %v709_v50 = vpop.permute.xlu1 %708 }
 0x153   : > { %v735_v43 = vsel %vm734_vm12, %v709_v50, %v705_v51 }
 0x156   : > { %v754_v53 = vpop.permute.xlu1 %753 }
 0x15a   : > { %v758_v54 = vpop.permute.xlu1 %757 }
 0x15b   : > { %v783_v33 = vsel %vm734_vm12, %v758_v54, %v754_v53 }
 0x15c   : > { %v951_v37 = vpop.eup %950 }
 0x15d   : > { %v693_v38 = vmul.f32 0.6931472, %v951_v37 }
 0x15e   : > { %v713_v55 = vpop.permute.xlu1 %712 }
 0x15f   : > { %v694_v41 = vsub.f32 %v693_v38, %v1101_v47  ;;  %v770_v47 = vpop.permute.xlu0 %769  ;;  %v737_v63 = vsel %vm736_vm13, %v713_v55, %v735_v43 }
 0x161   : > { %v695_v42 = vmul.f32 %v694_v41, %v682_v39 }
 0x162   : > { %v762_v56 = vpop.permute.xlu1 %761 }
 0x163   : > { %v696_v44 = vsel %vm670_vm0, %v695_v42, 0.0  ;;  %v784_v59 = vsel %vm736_vm13, %v762_v56, %v783_v33  ;;  %v774_v60 = vpop.permute.xlu0 %773  ;;  %vm742_vm0 = vcmask 1045509  }
 0x164   : > { %697 = vadd.xlane.f32.xlu1 %v696_v44 }
 0x166   : > { %v717_v57 = vpop.permute.xlu1 %716 }
 0x167   : > { %v778_v2 = vpop.permute.xlu0 %777  ;;  %v739_v3 = vsel %vm738_vm14, %v717_v57, %v737_v63 }
 0x16a   : > { %v766_v58 = vpop.permute.xlu1 %765 }
 0x16b   : > { %v785_v62 = vsel %vm738_vm14, %v766_v58, %v784_v59  ;;  %v782_v9 = vpop.permute.xlu0 %781 }
 0x16c   : > { %v786_v0 = vsel %vm740_vm15, %v770_v47, %v785_v62 }
 0x16d   : > { %v787_v5 = vsel %vm742_vm0, %v774_v60, %v786_v0 }
 0x16e   : > { %v721_v52 = vpop.permute.xlu1 %720  ;;  %v788_v8 = vsel %vm744_vm1, %v778_v2, %v787_v5 }
 0x16f   : > { %v741_v6 = vsel %vm740_vm15, %v721_v52, %v739_v3  ;;  %v789_v1 = vsel %vm746_vm2, %v782_v9, %v788_v8 }
 0x170   : > { %v791_v17 = vsel %vm750_vm3, %v789_v1, 0.0 }
 0x172   : > { %v725_v61 = vpop.permute.xlu1 %724 }
 0x173   : > { %v743_v11 = vsel %vm742_vm0, %v725_v61, %v741_v6 }
 0x175   : > { %732 = vperm.xlu1 %947, %v607_v49  }
 0x176   : > { %v729_v4 = vpop.permute.xlu1 %728 }
 0x177   : > { %v745_v12 = vsel %vm744_vm1, %v729_v4, %v743_v11 }
 0x1ed   : > { %v698_v10 = vpop.xlane.xlu1 %697 }
 0x1ee   : > { %v798_v20 = vsel %vm797_vm6, %v698_v10, 0.0 }
 0x1f1   : > { %v733_v13 = vpop.permute.xlu1 %732 }
 0x1f2   : > { %v747_v16 = vsel %vm746_vm2, %v733_v13, %v745_v12 }
 0x1f3   : > { %v749_v18 = vsel %vm701_vm4, %v747_v16, 0.0 }
 0x1f4   : > { %v792_v14 = vadd.f32 %v791_v17, %v749_v18 }
 0x1f6   : > { %v796_v19 = vadd.f32 %v795_v35, %v792_v14 }
 0x1f8   : > { %v799_v21 = vadd.f32 %v798_v20, %v796_v19 }
 0x1fa   : > { %800 = vst [vmem:[%s437_s20] sm:$0xff] %v799_v21 }
 0x1fb PF: > { %p13_p9 = scmp.ge.s32.totalorder %s1031_s25, 5   ;;  %s1212_s21 = smov %s970_s22 }
 0x1fc   : > { %s1213_s22 = smov %s1040_s28  ;;  %s1214_s23 = smov %s1031_s25 }
 0x1fd   :  { %15 = sbr.rel (!%p13_p9) target bundleno = 2 (0x2), region = 172 }

</bundles_post_ra>
